<compile_context>
chip_gen: v7x
topology: tpu7x:2x2x1
jax: 0.10.0
libtpu: 0.0.40
codegen_flags: <defaults>
</compile_context>

<pallas_src>
import functools
import math

import jax
import jax.numpy as jnp
from jax.experimental import pallas as pl
from jax.experimental.pallas import tpu as pltpu


def _round_up(x, m):
    return ((x + m - 1) // m) * m


# --------------------------------------------------------------------------- #
# Kernel
# --------------------------------------------------------------------------- #
def _mlm_head_kernel(x_ref, w1_ref, b1_ref, gamma_ref, beta_ref, w2_ref, b2_ref,
                     *refs, eps, with_hidden):
    if with_hidden:
        out_ref, hid_ref, h_ref = refs
    else:
        out_ref, h_ref = refs
        hid_ref = None

    # ---- transform (dense + exact-erf GELU + LayerNorm), once per row tile ----
    @pl.when(pl.program_id(1) == 0)
    def _():
        h = jnp.dot(x_ref[...], w1_ref[...],
                    preferred_element_type=jnp.float32) + b1_ref[...]
        # exact GELU (erf form), matching torch.nn.functional.gelu default
        h = 0.5 * h * (1.0 + jax.lax.erf(h * (1.0 / math.sqrt(2.0))))
        # LayerNorm over the hidden axis
        mean = jnp.mean(h, axis=-1, keepdims=True)
        centered = h - mean
        var = jnp.mean(centered * centered, axis=-1, keepdims=True)
        h = centered * jax.lax.rsqrt(var + eps)
        h = h * gamma_ref[...] + beta_ref[...]
        h_ref[...] = h.astype(h_ref.dtype)          # cache for all vocab tiles
        if hid_ref is not None:
            hid_ref[...] = h.astype(hid_ref.dtype)  # optional hidden_states output

    # ---- decoder: (rt, H) @ (H, vt) + bias, f32 accumulation ----
    logits = jnp.dot(h_ref[...], w2_ref[...],
                     preferred_element_type=jnp.float32) + b2_ref[...]
    out_ref[...] = logits.astype(out_ref.dtype)


# --------------------------------------------------------------------------- #
# Tile selection (generation-gated)
# --------------------------------------------------------------------------- #
def _tile_defaults():
    """Returns (row_tile, vocab_tile, vmem_limit_bytes) for the local TPU gen."""
    try:
        vmem = pltpu.get_tpu_info().vmem_capacity_bytes
    except Exception:
        vmem = 64 * 1024 * 1024                      # conservative: v7x 64 MiB/TC
    if vmem >= 100 * 1024 * 1024:                    # v5e / v6e: 128 MiB VMEM
        return 1024, 4096, 100 * 1024 * 1024
    return 1024, 2048, 48 * 1024 * 1024              # v7x: stay under 64 MiB


def _pick_row_tile(M, row_tile):
    # bf16 packs 16 rows per sublane tile -> rt must be a multiple of 16;
    # multiples of 256 match the 256x256 MXU on v6e/v7x.
    if M < 2 * 256:
        return _round_up(M, 16)                      # small M: one padded tile
    rt = min(row_tile, (M // 2) // 256 * 256)        # keep >=2 row tiles (megacore)
    return max(rt, 256)


def _pick_vocab_tile(V, vocab_tile):
    if V % 128 == 0:
        return min(vocab_tile, V)
    if V <= vocab_tile:
        return V                                     # full-extent block (always legal)
    # Ragged case: tightest 128-multiple tile for ceil(V / vocab_tile) tiles, so
    # only a thin slice of the last tile is wasted (Pallas masks its OOB writes).
    n_tiles = pl.cdiv(V, vocab_tile)
    return _round_up(pl.cdiv(V, n_tiles), 128)


# --------------------------------------------------------------------------- #
# Weight preparation (hoisted out of the per-call path)
# --------------------------------------------------------------------------- #
def prepare_mlm_head_params(params, matmul_dtype=jnp.bfloat16):
    """One-time prep: PyTorch nn.Linear weight is [out, in]; pre-transpose to
    [in, out] and cast matmul operands once at load time."""
    H = params["dense_w"].shape[1]
    V = params["decoder_w"].shape[0]
    return {
        "w1": jnp.asarray(params["dense_w"]).T.astype(matmul_dtype),           # [H, H]
        "b1": jnp.asarray(params["dense_b"]).reshape(1, H).astype(jnp.float32),
        "gamma": jnp.asarray(params["ln_gamma"]).reshape(1, H).astype(jnp.float32),
        "beta": jnp.asarray(params["ln_beta"]).reshape(1, H).astype(jnp.float32),
        "w2": jnp.asarray(params["decoder_w"]).T.astype(matmul_dtype),          # [H, V]
        "b2": jnp.asarray(params["decoder_b"]).reshape(1, V).astype(jnp.float32),
    }


# --------------------------------------------------------------------------- #
# Forward
# --------------------------------------------------------------------------- #
def new_bert_only_mlm_head(sequence_output, params, *, return_keywords_reps=False,
                           eps=1e-12, row_tile=None, vocab_tile=None,
                           out_dtype=None, matmul_dtype=jnp.bfloat16,
                           vmem_limit_bytes=None):
    """sequence_output: [B, S, H]. `params` is either the raw PyTorch-convention
    dict (see init_params) or the output of prepare_mlm_head_params()."""
    prep = params if "w1" in params else prepare_mlm_head_params(params, matmul_dtype)
    w1, b1, gamma, beta = prep["w1"], prep["b1"], prep["gamma"], prep["beta"]
    w2, b2 = prep["w2"], prep["b2"]
    mm_dtype = w1.dtype

    B, S, H = sequence_output.shape
    V = w2.shape[1]
    M = B * S
    out_dtype = sequence_output.dtype if out_dtype is None else out_dtype

    d_rt, d_vt, d_vmem = _tile_defaults()
    rt = _pick_row_tile(M, d_rt if row_tile is None else row_tile)
    vt = _pick_vocab_tile(V, d_vt if vocab_tile is None else vocab_tile)
    vmem_limit = d_vmem if vmem_limit_bytes is None else vmem_limit_bytes

    M_pad = _round_up(M, rt)
    x2d = sequence_output.reshape(M, H).astype(mm_dtype)
    if M_pad != M:
        x2d = jnp.pad(x2d, ((0, M_pad - M), (0, 0)))   # cheap vs. the M x V logits

    grid = (M_pad // rt, pl.cdiv(V, vt))

    out_shapes = [jax.ShapeDtypeStruct((M_pad, V), out_dtype)]
    out_specs = [pl.BlockSpec((rt, vt), lambda i, j: (i, j))]
    if return_keywords_reps:
        out_shapes.append(jax.ShapeDtypeStruct((M_pad, H), out_dtype))
        out_specs.append(pl.BlockSpec((rt, H), lambda i, j: (i, 0)))

    kernel = functools.partial(_mlm_head_kernel, eps=eps,
                               with_hidden=return_keywords_reps)

    msize = jnp.dtype(mm_dtype).itemsize
    osize = jnp.dtype(out_dtype).itemsize

    outs = pl.pallas_call(
        kernel,
        out_shape=tuple(out_shapes),
        grid_spec=pltpu.PrefetchScalarGridSpec(
            num_scalar_prefetch=0,
            grid=grid,
            in_specs=[
                pl.BlockSpec((rt, H), lambda i, j: (i, 0)),   # x rows
                pl.BlockSpec((H, H), lambda i, j: (0, 0)),    # dense W^T (resident)
                pl.BlockSpec((1, H), lambda i, j: (0, 0)),    # dense bias
                pl.BlockSpec((1, H), lambda i, j: (0, 0)),    # LN gamma
                pl.BlockSpec((1, H), lambda i, j: (0, 0)),    # LN beta
                pl.BlockSpec((H, vt), lambda i, j: (0, j)),   # decoder W^T tile
                pl.BlockSpec((1, vt), lambda i, j: (0, j)),   # decoder bias tile
            ],
            out_specs=tuple(out_specs),
            scratch_shapes=[pltpu.VMEM((rt, H), mm_dtype)],   # cached transform h
        ),
        compiler_params=pltpu.CompilerParams(
            dimension_semantics=("parallel", "arbitrary"),
            vmem_limit_bytes=vmem_limit,
        ),
        cost_estimate=pl.CostEstimate(
            flops=2 * M_pad * H * H + 2 * M_pad * H * V,
            transcendentals=M_pad * H,
            bytes_accessed=(M_pad * H + H * H) * msize
                           + (M_pad // rt) * H * V * msize
                           + M_pad * V * osize,
        ),
    )(x2d, w1, b1, gamma, beta, w2, b2)

    logits2d = outs[0]
    if M_pad != M:
        logits2d = logits2d[:M]
    logits = logits2d.reshape(B, S, V)
    if not return_keywords_reps:
        return logits
    hid2d = outs[1]
    if M_pad != M:
        hid2d = hid2d[:M]
    return {"hidden_states": hid2d.reshape(B, S, H), "logits": logits}


# --------------------------------------------------------------------------- #
# Test helpers
# --------------------------------------------------------------------------- #
def init_params(key, hidden_size, vocab_size):
    k1, k2, k3, k4 = jax.random.split(key, 4)
    scale = 0.02
    return {
        # PyTorch nn.Linear convention: weight is [out_features, in_features]
        "dense_w": scale * jax.random.normal(k1, (hidden_size, hidden_size), jnp.float32),
        "dense_b": scale * jax.random.normal(k2, (hidden_size,), jnp.float32),
        "ln_gamma": jnp.ones((hidden_size,), jnp.float32),
        "ln_beta": jnp.zeros((hidden_size,), jnp.float32),
        "decoder_w": scale * jax.random.normal(k3, (vocab_size, hidden_size), jnp.float32),
        "decoder_b": scale * jax.random.normal(k4, (vocab_size,), jnp.float32),
    }


def reference(sequence_output, params, eps=1e-12):
    """Pure-JAX f32 reference. Returns (logits, hidden_states)."""
    h = sequence_output @ params["dense_w"].T + params["dense_b"]
    h = 0.5 * h * (1.0 + jax.lax.erf(h / jnp.sqrt(2.0)))
    mean = jnp.mean(h, axis=-1, keepdims=True)
    var = jnp.mean((h - mean) ** 2, axis=-1, keepdims=True)
    h = (h - mean) * jax.lax.rsqrt(var + eps)
    h = h * params["ln_gamma"] + params["ln_beta"]
    logits = h @ params["decoder_w"].T + params["decoder_b"]
    return logits, h


if __name__ == "__main__":
    B, S, H, V = 2, 8, 32, 64  # batch, seq, hidden_size, vocab_size

    key = jax.random.PRNGKey(0)
    kx, kp = jax.random.split(key)
    sequence_output = jax.random.normal(kx, (B, S, H), jnp.float32)
    params = init_params(kp, H, V)

    ref_logits, ref_hidden = reference(sequence_output, params)

    # bf16-operand path with one-time weight prep (production path).
    prep_bf16 = prepare_mlm_head_params(params, matmul_dtype=jnp.bfloat16)
    logits = jax.block_until_ready(new_bert_only_mlm_head(sequence_output, prep_bf16))
    assert logits.shape == (B, S, V)
    assert logits.dtype == sequence_output.dtype  # emitted directly, no extra cast pass
    assert jnp.allclose(logits, ref_logits, atol=3e-2, rtol=3e-2), "bf16 path mismatch"

    # f32-operand path (tight structural/math check) + return_keywords_reps.
    prep_f32 = prepare_mlm_head_params(params, matmul_dtype=jnp.float32)
    out = new_bert_only_mlm_head(sequence_output, prep_f32, return_keywords_reps=True)
    logits_f32 = jax.block_until_ready(out["logits"])
    hidden_f32 = jax.block_until_ready(out["hidden_states"])
    assert jnp.allclose(logits_f32, ref_logits, atol=1e-3, rtol=1e-3), "f32 logits mismatch"
    assert jnp.allclose(hidden_f32, ref_hidden, atol=1e-3, rtol=1e-3), "f32 hidden mismatch"

    # Raw PyTorch-convention params still accepted (prep done internally).
    logits_raw = jax.block_until_ready(new_bert_only_mlm_head(sequence_output, params))
    assert jnp.allclose(logits_raw, ref_logits, atol=3e-2, rtol=3e-2), "raw-params path mismatch"

    print("KERNEL_OK")
</pallas_src>

<mosaic_0001>
module attributes {stable_mosaic.version = 11 : i64} {
  func.func @_mlm_head_kernel(%arg0: i32, %arg1: i32, %arg2: memref<16x32xbf16, #tpu.memory_space<vmem>>, %arg3: memref<32x32xbf16, #tpu.memory_space<vmem>>, %arg4: memref<1x32xf32, #tpu.memory_space<vmem>>, %arg5: memref<1x32xf32, #tpu.memory_space<vmem>>, %arg6: memref<1x32xf32, #tpu.memory_space<vmem>>, %arg7: memref<32x64xbf16, #tpu.memory_space<vmem>>, %arg8: memref<1x64xf32, #tpu.memory_space<vmem>>, %arg9: memref<16x64xf32, #tpu.memory_space<vmem>>, %arg10: memref<16x32xbf16, #tpu.memory_space<vmem>>) attributes {dimension_semantics = [#tpu.dimension_semantics<parallel>, #tpu.dimension_semantics<arbitrary>], iteration_bounds = array<i64: 1, 1>, scalar_prefetch = 0 : i64, scratch_operands = 1 : i64, tpu.core_type = #tpu.core_type<tc>, window_params = [{transform_indices = @transform_0, window_bounds = array<i64: 16, 32>}, {pipeline_mode = #tpu.pipeline_mode<synchronous>, transform_indices = @transform_1, window_bounds = array<i64: 32, 32>}, {pipeline_mode = #tpu.pipeline_mode<synchronous>, transform_indices = @transform_2, window_bounds = array<i64: 1, 32>}, {pipeline_mode = #tpu.pipeline_mode<synchronous>, transform_indices = @transform_3, window_bounds = array<i64: 1, 32>}, {pipeline_mode = #tpu.pipeline_mode<synchronous>, transform_indices = @transform_4, window_bounds = array<i64: 1, 32>}, {transform_indices = @transform_5, window_bounds = array<i64: 32, 64>}, {transform_indices = @transform_6, window_bounds = array<i64: 1, 64>}, {transform_indices = @transform_7, window_bounds = array<i64: 16, 64>}]} {
    %c0_i32 = arith.constant 0 : i32
    %0 = arith.cmpi eq, %arg1, %c0_i32 : i32
    %1 = arith.extui %0 : i1 to i32
    %c0_i32_0 = arith.constant 0 : i32
    %2 = arith.cmpi ne, %1, %c0_i32_0 : i32
    scf.if %2 {
      %c0_8 = arith.constant 0 : index
      %c0_9 = arith.constant 0 : index
      %10 = vector.load %arg2[%c0_8, %c0_9] : memref<16x32xbf16, #tpu.memory_space<vmem>>, vector<16x32xbf16>
      %c0_10 = arith.constant 0 : index
      %c0_11 = arith.constant 0 : index
      %11 = vector.load %arg3[%c0_10, %c0_11] : memref<32x32xbf16, #tpu.memory_space<vmem>>, vector<32x32xbf16>
      %cst_12 = arith.constant dense<0.000000e+00> : vector<16x32xf32>
      %12 = tpu.matmul %10, %11, %cst_12 {dimension_numbers = #tpu.dot_dimension_numbers<[1], [0], [0], [1], [0, 0, 1, 1], [], []>} : vector<16x32xbf16>, vector<32x32xbf16>, vector<16x32xf32> -> vector<16x32xf32>
      %c0_13 = arith.constant 0 : index
      %c0_14 = arith.constant 0 : index
      %13 = vector.load %arg4[%c0_13, %c0_14] : memref<1x32xf32, #tpu.memory_space<vmem>>, vector<1x32xf32>
      %14 = vector.broadcast %13 : vector<1x32xf32> to vector<16x32xf32>
      %15 = arith.addf %12, %14 : vector<16x32xf32>
      %cst_15 = arith.constant 5.000000e-01 : f32
      %16 = vector.broadcast %cst_15 : f32 to vector<16x32xf32>
      %17 = arith.mulf %16, %15 : vector<16x32xf32>
      %cst_16 = arith.constant 0.707106769 : f32
      %18 = vector.broadcast %cst_16 : f32 to vector<16x32xf32>
      %19 = arith.mulf %15, %18 : vector<16x32xf32>
      %20 = math.erf %19 : vector<16x32xf32>
      %cst_17 = arith.constant 1.000000e+00 : f32
      %21 = vector.broadcast %cst_17 : f32 to vector<16x32xf32>
      %22 = arith.addf %21, %20 : vector<16x32xf32>
      %23 = arith.mulf %17, %22 : vector<16x32xf32>
      %cst_18 = arith.constant dense<0.000000e+00> : vector<16xf32>
      %24 = vector.multi_reduction <add>, %23, %cst_18 [1] : vector<16x32xf32> to vector<16xf32>
      %25 = vector.shape_cast %24 : vector<16xf32> to vector<16x1xf32>
      %cst_19 = arith.constant 3.200000e+01 : f32
      %26 = vector.broadcast %cst_19 : f32 to vector<16x1xf32>
      %27 = arith.divf %25, %26 : vector<16x1xf32>
      %28 = vector.broadcast %27 : vector<16x1xf32> to vector<16x32xf32>
      %29 = arith.subf %23, %28 : vector<16x32xf32>
      %30 = arith.mulf %29, %29 : vector<16x32xf32>
      %cst_20 = arith.constant dense<0.000000e+00> : vector<16xf32>
      %31 = vector.multi_reduction <add>, %30, %cst_20 [1] : vector<16x32xf32> to vector<16xf32>
      %32 = vector.shape_cast %31 : vector<16xf32> to vector<16x1xf32>
      %cst_21 = arith.constant 3.200000e+01 : f32
      %33 = vector.broadcast %cst_21 : f32 to vector<16x1xf32>
      %34 = arith.divf %32, %33 : vector<16x1xf32>
      %cst_22 = arith.constant 9.99999996E-13 : f32
      %35 = vector.broadcast %cst_22 : f32 to vector<16x1xf32>
      %36 = arith.addf %34, %35 : vector<16x1xf32>
      %37 = math.rsqrt %36 : vector<16x1xf32>
      %38 = vector.broadcast %37 : vector<16x1xf32> to vector<16x32xf32>
      %39 = arith.mulf %29, %38 : vector<16x32xf32>
      %c0_23 = arith.constant 0 : index
      %c0_24 = arith.constant 0 : index
      %40 = vector.load %arg5[%c0_23, %c0_24] : memref<1x32xf32, #tpu.memory_space<vmem>>, vector<1x32xf32>
      %41 = vector.broadcast %40 : vector<1x32xf32> to vector<16x32xf32>
      %42 = arith.mulf %39, %41 : vector<16x32xf32>
      %c0_25 = arith.constant 0 : index
      %c0_26 = arith.constant 0 : index
      %43 = vector.load %arg6[%c0_25, %c0_26] : memref<1x32xf32, #tpu.memory_space<vmem>>, vector<1x32xf32>
      %44 = vector.broadcast %43 : vector<1x32xf32> to vector<16x32xf32>
      %45 = arith.addf %42, %44 : vector<16x32xf32>
      %46 = arith.truncf %45 : vector<16x32xf32> to vector<16x32xbf16>
      %c0_27 = arith.constant 0 : index
      %c0_28 = arith.constant 0 : index
      %47 = vector.load %arg10[%c0_27, %c0_28] : memref<16x32xbf16, #tpu.memory_space<vmem>>, vector<16x32xbf16>
      tpu.vector_store %arg10[%c0_27, %c0_28], %46 {strides = array<i32>} : memref<16x32xbf16, #tpu.memory_space<vmem>>, vector<16x32xbf16>,
    } else {
    }
    %c0 = arith.constant 0 : index
    %c0_1 = arith.constant 0 : index
    %3 = vector.load %arg10[%c0, %c0_1] : memref<16x32xbf16, #tpu.memory_space<vmem>>, vector<16x32xbf16>
    %c0_2 = arith.constant 0 : index
    %c0_3 = arith.constant 0 : index
    %4 = vector.load %arg7[%c0_2, %c0_3] : memref<32x64xbf16, #tpu.memory_space<vmem>>, vector<32x64xbf16>
    %cst = arith.constant dense<0.000000e+00> : vector<16x64xf32>
    %5 = tpu.matmul %3, %4, %cst {dimension_numbers = #tpu.dot_dimension_numbers<[1], [0], [0], [1], [0, 0, 1, 1], [], []>} : vector<16x32xbf16>, vector<32x64xbf16>, vector<16x64xf32> -> vector<16x64xf32>
    %c0_4 = arith.constant 0 : index
    %c0_5 = arith.constant 0 : index
    %6 = vector.load %arg8[%c0_4, %c0_5] : memref<1x64xf32, #tpu.memory_space<vmem>>, vector<1x64xf32>
    %7 = vector.broadcast %6 : vector<1x64xf32> to vector<16x64xf32>
    %8 = arith.addf %5, %7 : vector<16x64xf32>
    %c0_6 = arith.constant 0 : index
    %c0_7 = arith.constant 0 : index
    %9 = vector.load %arg9[%c0_6, %c0_7] : memref<16x64xf32, #tpu.memory_space<vmem>>, vector<16x64xf32>
    tpu.vector_store %arg9[%c0_6, %c0_7], %8 {strides = array<i32>} : memref<16x64xf32, #tpu.memory_space<vmem>>, vector<16x64xf32>,
    return
  }
  func.func @transform_0(%arg0: i32, %arg1: i32) -> (i32, i32) {
    %c0_i32 = arith.constant 0 : i32
    %c0_i32_0 = arith.constant 0 : i32
    return %arg0, %c0_i32 : i32, i32
  }
  func.func @transform_1(%arg0: i32, %arg1: i32) -> (i32, i32) {
    %c0_i32 = arith.constant 0 : i32
    %c0_i32_0 = arith.constant 0 : i32
    %c0_i32_1 = arith.constant 0 : i32
    return %c0_i32, %c0_i32_0 : i32, i32
  }
  func.func @transform_2(%arg0: i32, %arg1: i32) -> (i32, i32) {
    %c0_i32 = arith.constant 0 : i32
    %c0_i32_0 = arith.constant 0 : i32
    %c0_i32_1 = arith.constant 0 : i32
    return %c0_i32, %c0_i32_0 : i32, i32
  }
  func.func @transform_3(%arg0: i32, %arg1: i32) -> (i32, i32) {
    %c0_i32 = arith.constant 0 : i32
    %c0_i32_0 = arith.constant 0 : i32
    %c0_i32_1 = arith.constant 0 : i32
    return %c0_i32, %c0_i32_0 : i32, i32
  }
  func.func @transform_4(%arg0: i32, %arg1: i32) -> (i32, i32) {
    %c0_i32 = arith.constant 0 : i32
    %c0_i32_0 = arith.constant 0 : i32
    %c0_i32_1 = arith.constant 0 : i32
    return %c0_i32, %c0_i32_0 : i32, i32
  }
  func.func @transform_5(%arg0: i32, %arg1: i32) -> (i32, i32) {
    %c0_i32 = arith.constant 0 : i32
    %c0_i32_0 = arith.constant 0 : i32
    return %c0_i32, %arg1 : i32, i32
  }
  func.func @transform_6(%arg0: i32, %arg1: i32) -> (i32, i32) {
    %c0_i32 = arith.constant 0 : i32
    %c0_i32_0 = arith.constant 0 : i32
    return %c0_i32, %arg1 : i32, i32
  }
  func.func @transform_7(%arg0: i32, %arg1: i32) -> (i32, i32) {
    %c0_i32 = arith.constant 0 : i32
    return %arg0, %arg1 : i32, i32
  }
}

</mosaic_0001>

<bundles_post_ra>
// kernel: tpu_custom_call.1
= control target key start
LH: loop header
LB: loop body
LE: loop exit
PB: predicated region body
PF: predicated region fallthrough
CT: control target
= control target key end

     0   :  { %12 = vsyncpa [#allocation4], 0  ;;  %s570_s0 = inlined_call_operand.hbm [shape: bf16[16,32], index: 0, kind: input, shape index: {}]   ;;  %s571_s1 = inlined_call_operand.hbm [shape: bf16[32,32], index: 1, kind: input, shape index: {}]   ;;  %s572_s2 = inlined_call_operand.vmem [shape: f32[1,32], index: 2, kind: input, shape index: {}]   ;;  %s573_s3 = inlined_call_operand.vmem [shape: f32[1,32], index: 3, kind: input, shape index: {}]   ;;  %s574_s4 = inlined_call_operand.hbm [shape: f32[1,32], index: 4, kind: input, shape index: {}]   ;;  %s575_s5 = inlined_call_operand.vmem [shape: bf16[32,64], index: 5, kind: input, shape index: {}]   ;;  %s576_s6 = inlined_call_operand.vmem [shape: f32[1,64], index: 6, kind: input, shape index: {}]   ;;  %s577_s7 = inlined_call_operand.hbm [shape: f32[16,64], index: 7, kind: output, shape index: {}]  }
   0x1   :  { %13 = vsyncpa [#allocation7], 0 }
   0x2   :  { %14 = vsyncpa [#allocation5], 0  ;;  %s443_s24 = smov [#allocation6]   ;;  %s444_s26 = smov [#allocation3]  }
   0x3   :  { %s32_s25 = sshll.u32 %s443_s24, 4  ;;  %s20_s27 = sshll.u32 %s444_s26, 4  ;;  %s33_s25 = int_to_ptr.vmem [resolvable:$true] %s32_s25  ;;  %s493_s27 = int_to_ptr.vmem [resolvable:$true] %s20_s27 }
   0x4   :  { %s349_s30 = scalar_lea.hbm %s571_s1, 256 }
   0x5   :  { %p350_p0 = scmp.ne.s32.totalorder %s571_s1, %s349_s30  ;;  %p353_p1 = scmp.lt.u32.totalorder %s349_s30, %s571_s1 }
   0x7   :  { %p355_p2 = pnand %p353_p1, %p350_p0 }
   0x9   :  { %358 = shalt.err (!%p355_p2)
}
   0xa   :  { %s359_s12 = scalar_lea.vmem %s33_s25, 256  ;;  %p364_p4 = scmp.lt.s32.totalorder %s33_s25, %s33_s25 }
   0xb   :  { %p360_p3 = scmp.ne.s32.totalorder %s33_s25, %s359_s12  ;;  %p365_p5 = scmp.lt.s32.totalorder %s359_s12, %s359_s12 }
   0xd   :  { %p366_p6 = por %p365_p5, %p364_p4 }
   0xf   :  { %p367_p7 = pnand %p366_p6, %p360_p3 }
  0x11   :  { %370 = shalt.err (!%p367_p7)
}
  0x12   :  { %s445_s13 = smov 64   ;;  %s446_s14 = smov 4  }
  0x13   :  { %38 = dma.hbm_to_vmem [thread:$0]  %s571_s1, 256, %s33_s25, [#allocation7], %s445_s13, %s445_s13, %s446_s14  }
  0x14   :  { %s371_s19 = scalar_lea.hbm %s570_s0, 128 }
  0x15   :  { %p372_p8 = scmp.ne.s32.totalorder %s570_s0, %s371_s19  ;;  %p375_p9 = scmp.lt.u32.totalorder %s371_s19, %s570_s0 }
  0x17   :  { %p377_p10 = pnand %p375_p9, %p372_p8 }
  0x19   :  { %380 = shalt.err (!%p377_p10)
}
  0x1a   :  { %s381_s24 = scalar_lea.vmem %s493_s27, 128  ;;  %p386_p12 = scmp.lt.s32.totalorder %s493_s27, %s493_s27 }
  0x1b   :  { %p382_p11 = scmp.ne.s32.totalorder %s493_s27, %s381_s24  ;;  %p387_p13 = scmp.lt.s32.totalorder %s381_s24, %s381_s24 }
  0x1d   :  { %p388_p0 = por %p387_p13, %p386_p12 }
  0x1f   :  { %p389_p1 = pnand %p388_p0, %p382_p11 }
  0x21   :  { %392 = shalt.err (!%p389_p1)
}
  0x22   :  { %26 = dma.hbm_to_vmem [thread:$0]  %s570_s0, 128, %s493_s27, [#allocation4], %s445_s13, %s445_s13, %s446_s14  }
  0x23   :  { %s447_s26 = smov [#allocation8]   ;;  %s393_s8 = scalar_lea.hbm %s574_s4, 16 }
  0x24   :  { %s49_s28 = sshll.u32 %s447_s26, 4  ;;  %p394_p2 = scmp.ne.s32.totalorder %s574_s4, %s393_s8  ;;  %s50_s28 = int_to_ptr.vmem [resolvable:$true] %s49_s28 }
  0x25   :  { %p397_p3 = scmp.lt.u32.totalorder %s393_s8, %s574_s4 }
  0x27   :  { %p399_p4 = pnand %p397_p3, %p394_p2 }
  0x29   :  { %402 = shalt.err (!%p399_p4)
}
  0x2a   :  { %s403_s15 = scalar_lea.vmem %s50_s28, 16  ;;  %s407_s0 = scalar_lea.vmem %s50_s28, 32 }
  0x2b   :  { %p404_p5 = scmp.ne.s32.totalorder %s50_s28, %s403_s15  ;;  %p408_p6 = scmp.lt.s32.totalorder %s50_s28, %s50_s28 }
  0x2c   :  { %p409_p7 = scmp.lt.s32.totalorder %s407_s0, %s403_s15 }
  0x2e   :  { %p410_p8 = por %p409_p7, %p408_p6 }
  0x30   :  { %p411_p9 = pnand %p410_p8, %p404_p5 }
  0x32   :  { %414 = shalt.err (!%p411_p9)
}
  0x33   :  { %52 = dma.hbm_to_vmem [thread:$0]  %s574_s4, 16, %s50_s28, [#allocation7]  }
  0x34   :  { %437 = dma.done.wait [#allocation4], 128  }
  0x35   :  { %438 = vsyncadd [#allocation4], 4294967168 }
  0x36   :  { %439 = dma.done.wait [#allocation7], 272  }
  0x37   :  { %440 = vsyncadd [#allocation7], 4294967024  ;;  %v448_v0 = vmov 0.0   ;;  %vm449_vm0 = vmmov 0   ;;  %v336_v1 = vld [vmem:[#allocation6] sm:$0xff]   ;;  %v337_v2 = vld [vmem:[#allocation6 + $0x8] sm:$0xff]  }
  0x38   :  { %310 = vmatprep.subr.bf16.mxu0 %v448_v0  ;;  %314 = vmatprep.mubr.msk.bf16.mxu0 %vm449_vm0, %v448_v0  ;;  %v338_v3 = vld [vmem:[#allocation3] sm:$0xff]   ;;  %vm101_vm1 = vcmask 261120   ;;  %v293_v4 = vld [vmem:[%s572_s2] ss:$0 sm:$0xff]  ;;  %v340_v34 = vld [vmem:[%s575_s5 + $0x8] sm:$0xff]   ;;  %s450_s22 = smov [#allocation9]  }
  0x39   :  { %318 = vmatprep.subr.bf16.mxu1 %v448_v0  ;;  %322 = vmatprep.mubr.msk.bf16.mxu1 %vm449_vm0, %v448_v0  ;;  %v339_v33 = vld [vmem:[%s575_s5] sm:$0xff]   ;;  %v299_v47 = vld [vmem:[#allocation8] ss:$0 sm:$0xff]  ;;  %s280_s23 = sshll.u32 %s450_s22, 4  ;;  %vm272_vm2 = vcmask 523264   ;;  %s281_s23 = int_to_ptr.vmem [resolvable:$true] %s280_s23 }
  0x3a   :  { %311 = vmatpush3.bf16.msra.mxu0 %v336_v1  ;;  %319 = vmatpush3.bf16.msra.mxu1 %v339_v33  ;;  %v298_v43 = vld [vmem:[%s573_s3] ss:$0 sm:$0xff]  ;;  %s415_s3 = scalar_lea.vmem %s281_s23, 256  ;;  %p420_p11 = scmp.lt.s32.totalorder %s281_s23, %s281_s23 }
  0x3b   :  { %312 = vmatprep.subr.bf16.mxu0 %v448_v0  ;;  %320 = vmatprep.subr.bf16.mxu1 %v448_v0  ;;  %v300_v53 = vld [vmem:[%s576_s6] ss:$0 sm:$0xff]  ;;  %p416_p10 = scmp.ne.s32.totalorder %s281_s23, %s415_s3  ;;  %p421_p12 = scmp.lt.s32.totalorder %s415_s3, %s415_s3 }
  0x3d   :  { %p422_p13 = por %p421_p12, %p420_p11 }
  0x3e   :  { %313 = vmatpush3.bf16.msra.mxu0 %v337_v2  ;;  %321 = vmatpush3.bf16.msra.mxu1 %v340_v34 }
  0x3f   :  { %p423_p0 = pnand %p422_p13, %p416_p10 }
  0x41   :  { %315 = vmatmul.mubr.msk.bf16.vlgmr.msra.gmra.mrb[0].mxu0 %vm101_vm1, %v338_v3 }
 0x114   :  { %v139_v5 = vpop.f32.mrb[0].mxu0 }
 0x115   :  { %v140_v6 = vadd.f32 %v293_v4, %v139_v5  ;;  %v316_v7 = vpop.f32.mrb[1].mxu0 }
 0x116   :  { %v142_v8 = vpop.f32.mrb[2].mxu0 }
 0x117   :  { %v148_v9 = vmul.f32 0.70710677, %v140_v6  ;;  %v143_v10 = vadd.f32 %v293_v4, %v142_v8  ;;  %v317_v11 = vpop.f32.mrb[3].mxu0  ;;  %v146_v14 = vmul.f32 0.5, %v140_v6 }
 0x119   :  { %341 = verf.f32 %v148_v9  ;;  %v149_v12 = vmul.f32 0.70710677, %v143_v10  ;;  %v147_v17 = vmul.f32 0.5, %v143_v10 }
 0x11b   :  { %343 = verf.f32 %v149_v12 }
 0x123   :  { %v342_v13 = vpop.eup %341 }
 0x124   :  { %v152_v15 = vadd.f32 1.0, %v342_v13 }
 0x125   :  { %v344_v16 = vpop.eup %343 }
 0x126   :  { %v154_v18 = vmul.f32 %v152_v15, %v146_v14  ;;  %v153_v19 = vadd.f32 1.0, %v344_v16 }
 0x128   :  { %v156_v20 = vsel %vm101_vm1, %v154_v18, 0.0  ;;  %v155_v21 = vmul.f32 %v153_v19, %v147_v17 }
 0x129   :  { %157 = vadd.xlane.f32.xlu0 %v156_v20 }
 0x12a   :  { %v159_v22 = vsel %vm101_vm1, %v155_v21, 0.0 }
 0x12d   :  { %160 = vadd.xlane.f32.xlu0 %v159_v22 }
 0x1b6   :  { %v158_v23 = vpop.xlane.xlu0 %157 }
 0x1b7   :  { %v163_v24 = vmul.f32 0.03125, %v158_v23 }
 0x1b9   :  { %v165_v25 = vsub.f32 %v154_v18, %v163_v24 }
 0x1ba   :  { %v161_v26 = vpop.xlane.xlu0 %160 }
 0x1bb   :  { %v164_v27 = vmul.f32 0.03125, %v161_v26  ;;  %v167_v28 = vmul.f32 %v165_v25, %v165_v25 }
 0x1bd   :  { %v166_v29 = vsub.f32 %v155_v21, %v164_v27  ;;  %v169_v30 = vsel %vm101_vm1, %v167_v28, 0.0 }
 0x1be   :  { %170 = vadd.xlane.f32.xlu1 %v169_v30 }
 0x1bf   :  { %v168_v31 = vmul.f32 %v166_v29, %v166_v29 }
 0x1c1   :  { %v172_v32 = vsel %vm101_vm1, %v168_v31, 0.0 }
 0x1c2   :  { %173 = vadd.xlane.f32.xlu1 %v172_v32 }
 0x24b   :  { %v171_v35 = vpop.xlane.xlu1 %170 }
 0x24c   :  { %v175_v36 = vmul.f32 0.03125, %v171_v35 }
 0x24e   :  { %v177_v37 = vadd.f32 1e-12, %v175_v36 }
 0x24f   :  { %v174_v38 = vpop.xlane.xlu1 %173 }
 0x250   :  { %345 = vrsqrt.f32 %v177_v37  ;;  %v176_v39 = vmul.f32 0.03125, %v174_v38 }
 0x252   :  { %v178_v40 = vadd.f32 1e-12, %v176_v39 }
 0x254   :  { %347 = vrsqrt.f32 %v178_v40 }
 0x25a   :  { %v346_v41 = vpop.eup %345 }
 0x25b   :  { %v181_v42 = vmul.f32 %v346_v41, %v165_v25 }
 0x25d   :  { %v190_v45 = vmul.f32 %v298_v43, %v181_v42 }
 0x25e   :  { %v348_v44 = vpop.eup %347 }
 0x25f   :  { %v182_v46 = vmul.f32 %v348_v44, %v166_v29  ;;  %v199_v49 = vadd.f32 %v299_v47, %v190_v45 }
 0x261   :  { %v191_v48 = vmul.f32 %v298_v43, %v182_v46 }
 0x263   :  { %v200_v50 = vadd.f32 %v299_v47, %v191_v48 }
 0x265   :  { %v201_v51 = vpack.c.bf16 %v200_v50, %v199_v49 }
 0x267   :  { %202 = vst.msk [vmem:[#allocation2] sm:$0xff] %vm101_vm1, %v201_v51 }
 0x26e   :  { %v203_v52 = vld [vmem:[#allocation2] sm:$0xff] }
 0x26f   :  { %323 = vmatmul.mubr.msk.bf16.vlgmr.msra.gmra.mrb[0].mxu1 %vm101_vm1, %v203_v52 }
 0x342   :  { %v265_v54 = vpop.f32.mrb[0].mxu1 }
 0x343   :  { %v266_v55 = vadd.f32 %v300_v53, %v265_v54  ;;  %v324_v56 = vpop.f32.mrb[1].mxu1 }
 0x344   :  { %v268_v57 = vpop.f32.mrb[2].mxu1 }
 0x345   :  { %273 = vst.msk [vmem:[#allocation9] sm:$0xff] %vm272_vm2, %v266_v55  ;;  %v269_v58 = vadd.f32 %v300_v53, %v268_v57  ;;  %v325_v59 = vpop.f32.mrb[3].mxu1 }
 0x347   :  { %274 = vst.msk [vmem:[#allocation9 + $0x8] sm:$0xff] %vm272_vm2, %v269_v58 }
 0x348   :  { %426 = shalt.err (!%p423_p0)
}
 0x349   :  { %s427_s1 = scalar_lea.hbm %s577_s7, 256 }
 0x34a   :  { %p428_p1 = scmp.ne.s32.totalorder %s577_s7, %s427_s1  ;;  %p431_p2 = scmp.lt.u32.totalorder %s427_s1, %s577_s7 }
 0x34c   :  { %p433_p3 = pnand %p431_p2, %p428_p1 }
 0x34e   :  { %436 = shalt.err (!%p433_p3)
}
 0x34f   :  { %s451_s30 = smov 128   ;;  %s452_s8 = smov 8  }
 0x350   :  { %286 = dma.vmem_to_hbm [thread:$0]  %s281_s23, 256, %s577_s7, [#allocation5], %s451_s30, %s451_s30, %s452_s8  }
 0x351   :  { %441 = dma.done.wait [#allocation5], 256  }
 0x352   :  { %442 = vsyncadd [#allocation5], 4294967040 }
 0x353   :  { %290 = vsyncpa [#allocation4], 1 }
 0x354   :  { %291 = vsyncpa [#allocation7], 1 }
 0x355   :  { %292 = vsyncpa [#allocation5], 1 }

</bundles_post_ra>
